<compile_context>
chip_gen: v7x
topology: tpu7x:2x2x1
jax: 0.10.0
libtpu: 0.0.40
codegen_flags: <defaults>
</compile_context>

<pallas_src>
import functools

import jax
import jax.numpy as jnp
from jax.experimental import pallas as pl
from jax.experimental.pallas import tpu as pltpu


def _norm_kernel(x_ref, alpha_ref, bias_ref, o_ref, *, eps):
    x = x_ref[...].astype(jnp.float32)                       # (tm, D)
    d = x.shape[-1]
    # Single pass over x: both XLU reductions read the same vregs.
    s1 = jnp.sum(x, axis=-1, keepdims=True)                  # (tm, 1)
    s2 = jnp.sum(x * x, axis=-1, keepdims=True)              # (tm, 1)
    mean = s1 * (1.0 / d)
    # Unbiased variance (torch.std default ddof=1): (sum(x^2) - sum(x)*mean)/(D-1)
    var = (s2 - s1 * mean) * (1.0 / (d - 1))
    var = jnp.maximum(var, 0.0)                              # guard fp cancellation
    std = jnp.sqrt(var)
    inv = pl.reciprocal(std + eps, approx=False)             # one per row (EUP)
    alpha = alpha_ref[...].astype(jnp.float32)               # (1, D)
    bias = bias_ref[...].astype(jnp.float32)                 # (1, D)
    o_ref[...] = (alpha * ((x - mean) * inv) + bias).astype(o_ref.dtype)


def _round_up(x, m):
    return (x + m - 1) // m * m


def _pick_block_rows(rows, d, dtype):
    """Row tile: ~2 MiB x-block cap, >= ~8 grid steps, clamped to the problem."""
    itemsize = jnp.dtype(dtype).itemsize
    sublane = max(8, 32 // itemsize)                # f32:8, bf16:16, int8/fp8:32
    # Streaming layernorm is HBM-bound: ~1-2 MiB blocks already sit at the HBM
    # roofline; bigger blocks only reduce pipeline depth and waste VMEM/vregs.
    target_block_bytes = 2 << 20
    tm_bytes_cap = max(sublane, target_block_bytes // max(d * itemsize, 1))
    tm_rows_cap = 2048
    # Aim for >= 8 grid steps so the pipeline has stages to hide DMA edges and
    # both v7x TensorCores get balanced real work.
    target_steps = 8
    tm_steps = _round_up(pl.cdiv(rows, target_steps), sublane)
    tm = min(tm_bytes_cap, tm_rows_cap, tm_steps)
    tm = max(sublane, (tm // sublane) * sublane)
    # Never exceed the (sublane-rounded) problem size — even for tiny inputs.
    tm = min(tm, _round_up(rows, sublane))
    return tm, sublane


def _vmem_limit_bytes(tm, d, itemsize):
    """Per-TensorCore-safe scoped-VMEM estimate for this kernel's footprint."""
    block = tm * d * itemsize                       # one x (or out) block
    f32 = tm * d * 4                                # one f32 working tile
    # 2x double-buffered input + 2x double-buffered output + ~4 f32 temps
    # (astype copy, x*x, x-mean, pre-cast result) + params + slack.
    est = 4 * block + 4 * f32 + 8 * d * 4 + (2 << 20)
    return int(min(max(est, 16 << 20), 32 << 20))


def norm_layer(x, alpha, bias, eps=1e-6, block_rows=None):
    """x: (..., D), alpha/bias: (D,). Returns same shape/dtype as x."""
    orig_shape = x.shape
    d = orig_shape[-1]
    x2 = x.reshape(-1, d)                                     # (R, D)
    rows = x2.shape[0]
    if rows == 0:
        return x

    itemsize = jnp.dtype(x.dtype).itemsize
    if block_rows is None:
        tm, sublane = _pick_block_rows(rows, d, x.dtype)
    else:
        sublane = max(8, 32 // itemsize)
        tm = max(sublane, _round_up(block_rows, sublane))
        tm = min(tm, _round_up(rows, sublane))

    # If the tile would cover the whole problem, use the exact row count as a
    # single full-extent block (always a legal block dim, no padding needed).
    if tm >= rows:
        tm = rows
    grid = (pl.cdiv(rows, tm),)

    alpha2 = alpha.reshape(1, d)
    bias2 = bias.reshape(1, d)

    kernel = functools.partial(_norm_kernel, eps=eps)

    out = pl.pallas_call(
        kernel,
        out_shape=jax.ShapeDtypeStruct((rows, d), x.dtype),
        grid_spec=pltpu.PrefetchScalarGridSpec(
            num_scalar_prefetch=0,
            grid=grid,
            in_specs=[
                pl.BlockSpec((tm, d), lambda i: (i, 0)),
                # Constant block index -> params stay resident, no re-DMA.
                pl.BlockSpec((1, d), lambda i: (0, 0)),
                pl.BlockSpec((1, d), lambda i: (0, 0)),
            ],
            out_specs=pl.BlockSpec((tm, d), lambda i: (i, 0)),
        ),
        compiler_params=pltpu.CompilerParams(
            dimension_semantics=("parallel",),
            vmem_limit_bytes=_vmem_limit_bytes(tm, d, itemsize),
        ),
    )(x2, alpha2, bias2)

    return out.reshape(orig_shape)


def _reference(x, alpha, bias, eps):
    d = x.shape[-1]
    mean = x.mean(axis=-1, keepdims=True)
    std = jnp.sqrt(jnp.sum((x - mean) ** 2, axis=-1, keepdims=True) / (d - 1))
    return alpha * (x - mean) / (std + eps) + bias


if __name__ == "__main__":
    key = jax.random.PRNGKey(0)

    # Small shapes consistent with the module: (batch, seq, d_model).
    # d_model=128 keeps the output lane-dense (multiple of 128 lanes).
    B, S, D = 2, 8, 128
    x = jax.random.normal(key, (B, S, D), dtype=jnp.float32)
    # deterministic parameter init per nn.Module.__init__: ones / zeros
    alpha = jnp.ones((D,), dtype=jnp.float32)
    bias = jnp.zeros((D,), dtype=jnp.float32)

    out = jax.block_until_ready(norm_layer(x, alpha, bias, eps=1e-6))
    ref = _reference(x, alpha, bias, 1e-6)
    assert jnp.allclose(out, ref, atol=1e-5, rtol=1e-5), "mismatch vs reference"

    # Ragged-tail path: row count (15) not divisible by the tile size -> exercises
    # the partial (masked) last block, no padding copies.
    x2 = jax.random.normal(jax.random.PRNGKey(1), (3, 5, D), dtype=jnp.float32)
    out2 = jax.block_until_ready(norm_layer(x2, alpha, bias, eps=1e-6))
    ref2 = _reference(x2, alpha, bias, 1e-6)
    assert jnp.allclose(out2, ref2, atol=1e-5, rtol=1e-5), "ragged-tail mismatch"

    # Multi-step grid path (rows=256 -> 8 grid steps with the auto policy).
    x3 = jax.random.normal(jax.random.PRNGKey(2), (4, 64, D), dtype=jnp.float32)
    out3 = jax.block_until_ready(norm_layer(x3, alpha, bias, eps=1e-6))
    ref3 = _reference(x3, alpha, bias, 1e-6)
    assert jnp.allclose(out3, ref3, atol=1e-5, rtol=1e-5), "multi-step mismatch"

    print("KERNEL_OK")
</pallas_src>

<mosaic_0001>
module attributes {stable_mosaic.version = 11 : i64} {
  func.func @_norm_kernel(%arg0: i32, %arg1: memref<8x128xf32, #tpu.memory_space<vmem>>, %arg2: memref<1x128xf32, #tpu.memory_space<vmem>>, %arg3: memref<1x128xf32, #tpu.memory_space<vmem>>, %arg4: memref<8x128xf32, #tpu.memory_space<vmem>>) attributes {dimension_semantics = [#tpu.dimension_semantics<parallel>], iteration_bounds = array<i64: 2>, scalar_prefetch = 0 : i64, scratch_operands = 0 : i64, tpu.core_type = #tpu.core_type<tc>, window_params = [{transform_indices = @transform_0, window_bounds = array<i64: 8, 128>}, {pipeline_mode = #tpu.pipeline_mode<synchronous>, transform_indices = @transform_1, window_bounds = array<i64: 1, 128>}, {pipeline_mode = #tpu.pipeline_mode<synchronous>, transform_indices = @transform_2, window_bounds = array<i64: 1, 128>}, {transform_indices = @transform_3, window_bounds = array<i64: 8, 128>}]} {
    %c0 = arith.constant 0 : index
    %c0_0 = arith.constant 0 : index
    %0 = vector.load %arg1[%c0, %c0_0] : memref<8x128xf32, #tpu.memory_space<vmem>>, vector<8x128xf32>
    %cst = arith.constant dense<0.000000e+00> : vector<8xf32>
    %1 = vector.multi_reduction <add>, %0, %cst [1] : vector<8x128xf32> to vector<8xf32>
    %2 = vector.shape_cast %1 : vector<8xf32> to vector<8x1xf32>
    %3 = arith.mulf %0, %0 : vector<8x128xf32>
    %cst_1 = arith.constant dense<0.000000e+00> : vector<8xf32>
    %4 = vector.multi_reduction <add>, %3, %cst_1 [1] : vector<8x128xf32> to vector<8xf32>
    %5 = vector.shape_cast %4 : vector<8xf32> to vector<8x1xf32>
    %cst_2 = arith.constant 7.812500e-03 : f32
    %6 = vector.broadcast %cst_2 : f32 to vector<8x1xf32>
    %7 = arith.mulf %2, %6 : vector<8x1xf32>
    %8 = arith.mulf %2, %7 : vector<8x1xf32>
    %9 = arith.subf %5, %8 : vector<8x1xf32>
    %cst_3 = arith.constant 0.00787401571 : f32
    %10 = vector.broadcast %cst_3 : f32 to vector<8x1xf32>
    %11 = arith.mulf %9, %10 : vector<8x1xf32>
    %cst_4 = arith.constant 0.000000e+00 : f32
    %12 = vector.broadcast %cst_4 : f32 to vector<8x1xf32>
    %13 = arith.maximumf %11, %12 : vector<8x1xf32>
    %14 = math.sqrt %13 : vector<8x1xf32>
    %cst_5 = arith.constant 9.99999997E-7 : f32
    %15 = vector.broadcast %cst_5 : f32 to vector<8x1xf32>
    %16 = arith.addf %14, %15 : vector<8x1xf32>
    %17 = tpu.reciprocal %16 : vector<8x1xf32> -> vector<8x1xf32>
    %c0_6 = arith.constant 0 : index
    %c0_7 = arith.constant 0 : index
    %18 = vector.load %arg2[%c0_6, %c0_7] : memref<1x128xf32, #tpu.memory_space<vmem>>, vector<1x128xf32>
    %c0_8 = arith.constant 0 : index
    %c0_9 = arith.constant 0 : index
    %19 = vector.load %arg3[%c0_8, %c0_9] : memref<1x128xf32, #tpu.memory_space<vmem>>, vector<1x128xf32>
    %20 = vector.broadcast %7 : vector<8x1xf32> to vector<8x128xf32>
    %21 = arith.subf %0, %20 : vector<8x128xf32>
    %22 = vector.broadcast %17 : vector<8x1xf32> to vector<8x128xf32>
    %23 = arith.mulf %21, %22 : vector<8x128xf32>
    %24 = vector.broadcast %18 : vector<1x128xf32> to vector<8x128xf32>
    %25 = arith.mulf %24, %23 : vector<8x128xf32>
    %26 = vector.broadcast %19 : vector<1x128xf32> to vector<8x128xf32>
    %27 = arith.addf %25, %26 : vector<8x128xf32>
    %c0_10 = arith.constant 0 : index
    %c0_11 = arith.constant 0 : index
    %28 = vector.load %arg4[%c0_10, %c0_11] : memref<8x128xf32, #tpu.memory_space<vmem>>, vector<8x128xf32>
    tpu.vector_store %arg4[%c0_10, %c0_11], %27 {strides = array<i32>} : memref<8x128xf32, #tpu.memory_space<vmem>>, vector<8x128xf32>,
    return
  }
  func.func @transform_0(%arg0: i32) -> (i32, i32) {
    %c0_i32 = arith.constant 0 : i32
    %c0_i32_0 = arith.constant 0 : i32
    return %arg0, %c0_i32 : i32, i32
  }
  func.func @transform_1(%arg0: i32) -> (i32, i32) {
    %c0_i32 = arith.constant 0 : i32
    %c0_i32_0 = arith.constant 0 : i32
    %c0_i32_1 = arith.constant 0 : i32
    return %c0_i32, %c0_i32_0 : i32, i32
  }
  func.func @transform_2(%arg0: i32) -> (i32, i32) {
    %c0_i32 = arith.constant 0 : i32
    %c0_i32_0 = arith.constant 0 : i32
    %c0_i32_1 = arith.constant 0 : i32
    return %c0_i32, %c0_i32_0 : i32, i32
  }
  func.func @transform_3(%arg0: i32) -> (i32, i32) {
    %c0_i32 = arith.constant 0 : i32
    %c0_i32_0 = arith.constant 0 : i32
    return %arg0, %c0_i32 : i32, i32
  }
}

</mosaic_0001>

<bundles_post_ra>
// kernel: tpu_custom_call.1
= control target key start
LH: loop header
LB: loop body
LE: loop exit
PB: predicated region body
PF: predicated region fallthrough
CT: control target
= control target key end

     0   :  { %8 = vsyncpa [#allocation3], 0  ;;  %s664_s0 = inlined_call_operand.hbm [shape: f32[16,128], index: 0, kind: input, shape index: {}]   ;;  %s665_s1 = inlined_call_operand.vmem [shape: f32[1,128], index: 1, kind: input, shape index: {}]   ;;  %s666_s2 = inlined_call_operand.vmem [shape: f32[1,128], index: 2, kind: input, shape index: {}]   ;;  %s667_s3 = inlined_call_operand.hbm [shape: f32[16,128], index: 3, kind: output, shape index: {}]  }
   0x1   :  { %10 = vsyncpa [#allocation3 + $0x1], 0 }
   0x2   :  { %11 = vsyncpa [#allocation4], 0 }
   0x3   :  { %13 = vsyncpa [#allocation4 + $0x1], 0  ;;  %s493_s12 = smov 0   ;;  %s495_s13 = smov 0  }
   0x4   :  { %s497_s14 = smov 0   ;;  %s499_s15 = smov 0  }
   0x5 LB: > { %s514_s16 = sadd.s32 4294967295, %s469_s15   ;;  %s309_s17 = sadd.s32 4294967294, %s469_s15   ;;  %s469_s15 = sphi %s499_s15, %s682_s15   ;;  %s465_s14 = sphi %s497_s14, %s681_s14   ;;  %s461_s13 = sphi %s495_s13, %s680_s13   ;;  %s457_s12 = sphi %s493_s12, %s679_s12  }
   0x6   : > { %s518_s18 = sadd.s32 1, %s469_s15   ;;  %s26_s19 = sadd.s32 1, %s465_s14 }
   0x7   : > { %s23_s20 = ssub.s32 %s469_s15, %s518_s18  ;;  %p33_p0 = scmp.ne.s32.totalorder %s465_s14, %s461_s13 }
   0x8   : > { %p24_p1 = scmp.eq.s32.totalorder %s23_s20, 0  ;;  %p34_p2 = scmp.eq.s32.totalorder %s469_s15, 0 }
   0x9   : > { %p39_p3 = scmp.ne.s32.totalorder %s461_s13, %s457_s12  ;;  %p40_p4 = scmp.eq.s32.totalorder %s514_s16, 0 }
   0xa   : > { %s530_s21 = scalar_select %p24_p1, %s465_s14, %s26_s19  }
   0xb   : > { %p532_p5 = por %p34_p2, %p33_p0  ;;  %p536_p6 = por %p40_p4, %p39_p3 }
   0xc   : > { %p105_p7 = scmp.eq.s32.totalorder %s514_s16, 1  ;;  %p111_p8 = scmp.eq.s32.totalorder %s309_s17, 1 }
   0xd   : > { %p335_p10 = scmp.lt.s32.totalorder %s469_s15, 2  ;;  %s137_s26 = sand.u32 1, %s465_s14  }
   0xe   : > { %p543_p11 = por %p105_p7, %p33_p0  ;;  %p547_p12 = por %p111_p8, %p39_p3 }
   0xf   : > { %s313_s27 = sshll.u32 %s469_s15, 7  ;;  %s312_s28 = sshll.u32 %s137_s26, 3 }
  0x10   : > { %s671_s24 = scalar_select %p543_p11, 1, 0 }
  0x11   : > { %s672_s25 = scalar_select %p547_p12, 1, 0 }
  0x12   : > { %s556_s4 = scalar_lea.hbm %s664_s0, %s313_s27  ;;  %s141_s5 = scalar_lea.vmem [#allocation2], %s312_s28 }
  0x13   : > { %s148_s6 = sshll.u32 %s141_s5, 4  ;;  %p560_p13 = pnand %p335_p10, %p532_p5  ;;  %s564_s6 = int_to_ptr.vmem [resolvable:$true] %s148_s6 }
  0x14   : > { %s138_s8 = scalar_lea.sflag [#allocation3], %s137_s26  ;;  %s373_s9 = scalar_lea.hbm %s556_s4, 128 }
  0x15   : > { %p374_p2 = scmp.ne.s32.totalorder %s556_s4, %s373_s9  ;;  %p375_p3 = pneg %p560_p13 }
  0x16   : > { %s378_s17 = scalar_lea.hbm %s664_s0, 256  ;;  %p379_p5 = scmp.lt.u32.totalorder %s556_s4, %s664_s0 }
  0x17   : > { %p376_p4 = pnand %p375_p3, %p374_p2  ;;  %p380_p8 = scmp.lt.u32.totalorder %s378_s17, %s373_s9 }
  0x18   : > { %p382_p9 = scmp.lt.u32.totalorder %s373_s9, %s556_s4 }
  0x19   : > { %p377_p7 = pneg %p376_p4  ;;  %p381_p10 = por %p380_p8, %p379_p5 }
  0x1b   : > { %p383_p0 = por %p382_p9, %p381_p10 }
  0x1d   : > { %p384_p1 = pnand %p383_p0, %p377_p7 }
  0x1f   : > { %387 = shalt.err (!%p384_p1)
}
  0x20   : > { %s388_s22 = scalar_lea.vmem %s564_s6, 128  ;;  %s471_s26 = smov [#allocation2]  }
  0x21   : > { %p389_p2 = scmp.ne.s32.totalorder %s564_s6, %s388_s22  ;;  %s393_s27 = sshll.u32 %s471_s26, 4  ;;  %s394_s27 = int_to_ptr.vmem [resolvable:$false] %s393_s27 }
  0x22   : > { %s395_s28 = scalar_lea.vmem %s394_s27, 256  ;;  %p396_p11 = scmp.lt.s32.totalorder %s564_s6, %s394_s27 }
  0x23   : > { %p391_p4 = pnand %p389_p2, %p375_p3  ;;  %p397_p5 = scmp.lt.s32.totalorder %s395_s28, %s388_s22 }
  0x25   : > { %p392_p12 = pneg %p391_p4  ;;  %p398_p8 = por %p397_p5, %p396_p11 }
  0x27   : > { %p399_p9 = pnand %p398_p8, %p392_p12 }
  0x29   : > { %402 = shalt.err (!%p399_p9)
}
  0x2a   : > { %330 = dma.hbm_to_vmem [thread:$0]  (!%p560_p13), %s556_s4, 128, %s564_s6, %s138_s8  }
  0x2b   : > { %p674_p0 = scmp.lt.s32.totalorder %s469_s15, 3  ;;  %p675_p1 = scmp.ge.s32.totalorder %s469_s15, 1 }
  0x2d   : > { %p154_p3 = pnand %p675_p1, %p674_p0 }
  0x2e   : > { %s598_s29 = sand.u32 (!%p154_p3), 1, %s461_s13  }
  0x2f   : > { %157 = sbr.rel (%p154_p3) target bundleno = 256 (0x100), region = 32  ;;  %s315_s30 = sshll.u32 (!%p154_p3), %s598_s29, 3 }
  0x30   : > { %s160_s5 = scalar_lea.sflag (!%p154_p3), [#allocation3], %s598_s29  ;;  %s163_s7 = scalar_lea.vmem (!%p154_p3), [#allocation2], %s315_s30 }
  0x36   : > { %448 = dma.done.wait (%p536_p6), %s160_s5, 128  }
  0x37   : > { %450 = vsyncadd (%p536_p6), %s160_s5, 4294967168  ;;  %v186_v0 = vld [vmem:[%s163_s7] sm:$0xff]  ;;  %s320_s9 = sshll.u32 %s514_s16, 7  ;;  %s185_s10 = scalar_lea.vmem [#allocation5], %s315_s30 }
  0x38   : > { %187 = vadd.xlane.f32.xlu0 %v186_v0  ;;  %v189_v1 = vmul.f32 %v186_v0, %v186_v0  ;;  %v317_v17 = vld [vmem:[%s665_s1] ss:$0 sm:$0xff]  ;;  %s239_s11 = sshll.u32 %s185_s10, 4  ;;  %s620_s20 = scalar_lea.hbm %s667_s3, %s320_s9  ;;  %s622_s11 = int_to_ptr.vmem [resolvable:$true] %s239_s11 }
  0x39   : > { %v318_v19 = vld [vmem:[%s666_s2] ss:$0 sm:$0xff]  ;;  %s226_s22 = scalar_lea.sflag [#allocation4], %s598_s29  ;;  %s403_s26 = scalar_lea.vmem %s622_s11, 128 }
  0x3a   : > { %p404_p6 = scmp.ne.s32.totalorder %s622_s11, %s403_s26  ;;  %p676_p11 = scmp.ne.s32.totalorder %s671_s24, 0 }
  0x3b   : > { %s472_s16 = smov [#allocation5]  }
  0x3c   : > { %190 = vadd.xlane.f32.xlu0 %v189_v1  ;;  %p405_p12 = pnand %p404_p6, %p676_p11  ;;  %s407_s27 = sshll.u32 %s472_s16, 4  ;;  %s408_s27 = int_to_ptr.vmem [resolvable:$false] %s407_s27 }
  0x3d   : > { %s409_s28 = scalar_lea.vmem %s408_s27, 256  ;;  %p410_p7 = scmp.lt.s32.totalorder %s622_s11, %s408_s27 }
  0x3e   : > { %p406_p13 = pneg %p405_p12  ;;  %p411_p10 = scmp.lt.s32.totalorder %s409_s28, %s403_s26 }
  0x40   : > { %p412_p2 = por %p411_p10, %p410_p7 }
  0x42   : > { %p413_p4 = pnand %p412_p2, %p406_p13 }
  0xc5   : > { %v188_v2 = vpop.xlane.xlu0 %187 }
  0xc6   : > { %v192_v3 = vmul.f32 0.0078125, %v188_v2 }
  0xc8   : > { %v193_v4 = vmul.f32 %v192_v3, %v188_v2  ;;  %v208_v15 = vsub.f32 %v186_v0, %v192_v3 }
  0xc9   : > { %v191_v5 = vpop.xlane.xlu0 %190 }
  0xca   : > { %v194_v6 = vsub.f32 %v191_v5, %v193_v4 }
  0xcc   : > { %v195_v7 = vmul.f32 0.007874016, %v194_v6 }
  0xce   : > { %v196_v8 = vmax.f32 %v195_v7, 0.0 }
  0xd0   : > { %369 = vrsqrt.f32 %v196_v8  ;;  %vm199_vm0 = vcmp.eq.f32.partialorder %v196_v8, inf  ;;  %v202_v11 = vand.u32 2147483648, %v196_v8  ;;  %vm201_vm1 = vcmp.eq.f32.partialorder %v196_v8, 0.0 }
  0xda   : > { %v370_v9 = vpop.eup %369 }
  0xdb   : > { %v198_v10 = vmul.f32 %v370_v9, %v196_v8 }
  0xdd   : > { %v200_v12 = vsel %vm199_vm0, %v196_v8, %v198_v10 }
  0xde   : > { %v203_v13 = vsel %vm201_vm1, %v202_v11, %v200_v12 }
  0xdf   : > { %v204_v14 = vadd.f32 1e-06, %v203_v13 }
  0xe1   : > { %371 = vrcp.f32 %v204_v14 }
  0xeb   : > { %v372_v16 = vpop.eup %371 }
  0xec   : > { %v209_v18 = vmul.f32 %v372_v16, %v208_v15 }
  0xee   : > { %v216_v20 = vmul.f32 %v317_v17, %v209_v18 }
  0xf0   : > { %v223_v21 = vadd.f32 %v318_v19, %v216_v20 }
  0xf2   : > { %224 = vst [vmem:[%s185_s10] sm:$0xff] %v223_v21 }
  0xf3   : > { %416 = shalt.err (!%p413_p4)
}
  0xf4   : > { %s417_s29 = scalar_lea.hbm %s620_s20, 128  ;;  %s421_s7 = scalar_lea.hbm %s667_s3, 256 }
  0xf5   : > { %p418_p5 = scmp.ne.s32.totalorder %s620_s20, %s417_s29  ;;  %p422_p0 = scmp.lt.u32.totalorder %s620_s20, %s667_s3 }
  0xf6   : > { %p423_p1 = scmp.lt.u32.totalorder %s421_s7, %s417_s29  ;;  %p425_p6 = scmp.lt.u32.totalorder %s417_s29, %s620_s20 }
  0xf7   : > { %p419_p8 = pnand %p418_p5, %p676_p11 }
  0xf8   : > { %p424_p3 = por %p423_p1, %p422_p0 }
  0xf9   : > { %p420_p9 = pneg %p419_p8 }
  0xfa   : > { %p426_p12 = por %p425_p6, %p424_p3 }
  0xfc   : > { %p427_p13 = pnand %p426_p12, %p420_p9 }
  0xfe   : > { %430 = shalt.err (!%p427_p13)
}
  0xff   : > { %325 = dma.vmem_to_hbm [thread:$0]  (%p676_p11), %s622_s11, 128, %s620_s20, %s226_s22  }
 0x100 PF: > { %s251_s6 = sand.u32 1, %s457_s12   ;;  %p677_p7 = scmp.ne.s32.totalorder %s672_s25, 0 }
 0x101   : > { %p678_p10 = scmp.ge.s32.totalorder %s469_s15, 2  ;;  %s252_s8 = scalar_lea.sflag [#allocation4], %s251_s6 }
 0x103   : > { %p332_p2 = pnand %p678_p10, %p677_p7 }
 0x105   : > { %452 = dma.done.wait (!%p332_p2), %s252_s8, 128  }
 0x106   : > { %454 = vsyncadd (!%p332_p2), %s252_s8, 4294967168  ;;  %p16_p4 = scmp.ge.s32.totalorder %s518_s18, 4   ;;  %s679_s12 = smov %s461_s13 }
 0x107   : > { %s680_s13 = smov %s465_s14  ;;  %s681_s14 = smov %s530_s21 }
 0x108   : > { %s682_s15 = smov %s518_s18  ;;  %18 = sbr.rel (!%p16_p4) target bundleno = 5 (0x5), region = 77 }
 0x10f   :  { %257 = vsyncpa [#allocation3], 1 }
 0x110   :  { %259 = vsyncpa [#allocation3 + $0x1], 1 }
 0x111   :  { %260 = vsyncpa [#allocation4], 1 }
 0x112   :  { %262 = vsyncpa [#allocation4 + $0x1], 1 }

</bundles_post_ra>
